<compile_context>
chip_gen: v7x
topology: tpu7x:2x2x1
jax: 0.10.0
libtpu: 0.0.40
codegen_flags: <defaults>
</compile_context>

<pallas_src>
import jax
import jax.numpy as jnp
from jax.experimental import pallas as pl
from jax.experimental.pallas import tpu as pltpu

_MIB = 1024 * 1024


def _spatial_attention_kernel(x_ref, w_ref, b_ref, out_ref, att_ref):
    # x_ref:   (1, C, t_hw)  feature block (lanes = spatial positions), native dtype
    # w_ref:   (1, C)        1x1 conv weight (out_channels = 1), native dtype
    # b_ref:   (1,)          conv bias (SMEM scalar, f32)
    # out_ref: (1, C, t_hw)  features * attention (native dtype)
    # att_ref: (1, 1, t_hw)  attention map (native dtype)
    x = x_ref[0]                                   # (C, t_hw) -- no f32 upcast
    w = w_ref[...]                                 # (1, C)
    b = b_ref[0]

    # Channel reduction on the MXU, accumulating in f32.
    att = jnp.dot(w, x, preferred_element_type=jnp.float32) + b   # (1, t_hw)

    att_ref[0] = att.astype(att_ref.dtype)                        # lane-dense store
    out_ref[0] = (x * att.astype(x.dtype)).astype(out_ref.dtype)  # sublane broadcast


def _tpu_generation_and_budget():
    """Return (generation tag, per-kernel VMEM budget in bytes)."""
    kind = ""
    try:
        kind = jax.devices()[0].device_kind.lower()
    except Exception:
        pass
    vmem_cap = None
    try:
        vmem_cap = pltpu.get_tpu_info().vmem_capacity_bytes
    except Exception:
        pass

    if "v7" in kind or (vmem_cap is not None and vmem_cap <= 64 * _MIB):
        # v7x: only 64 MiB VMEM per TensorCore -> cap the double-buffered footprint.
        return "v7x", 44 * _MIB
    if "v5" in kind:
        # v5e: modest tiles; default scoped VMEM is 16 MiB, raise it just a little.
        return "v5e", 20 * _MIB
    # v6e (128 MiB physical VMEM): exploit large tiles for this HBM-bound kernel.
    return "v6e", 80 * _MIB


def _pick_hw_tile(hw, c, itemsize, vmem_budget, *, need_multi_step=False):
    """Pick the spatial tile (lane count) for (1, C, t_hw) blocks.

    Per-lane VMEM (double-buffered pipeline blocks + in-kernel f32 scratch):
      2*(x block + out block) + 2*att block + f32 dot/product scratch.
    Only ~80% of the budget is committed, leaving headroom for compiler scratch.
    """
    per_lane = 5 * c * itemsize + 2 * itemsize + 8
    usable = int(vmem_budget * 0.8)
    cap = max(128, (usable // per_lane) // 128 * 128)

    if hw <= 128:
        # Single full-extent block (allowed even when hw is not a multiple of 128).
        return hw

    t = min(cap, (hw // 128) * 128)
    if need_multi_step and hw >= 256:
        # Give the megacore at least two grid steps along the spatial axis.
        t = min(t, max(128, ((hw // 2) // 128) * 128))
    return max(128, t)


def spatial_attention_pallas(features_nchw, weight, bias):
    """features_nchw: (N, C, H, W); weight: (1, C, 1, 1); bias: (1,).

    Returns (features * attention, attention), matching SpatialAttention.forward
    (a plain 1x1 conv, no activation on the attention map).
    """
    N, C, H, W = features_nchw.shape
    HW = H * W
    dtype = features_nchw.dtype

    x = features_nchw.reshape(N, C, HW)               # NCHW-native, no transpose
    w = weight.reshape(1, C).astype(dtype)
    b = bias.reshape(1).astype(jnp.float32)

    gen, vmem_budget = _tpu_generation_and_budget()
    t_hw = _pick_hw_tile(
        HW, C, dtype.itemsize, vmem_budget,
        need_multi_step=(gen == "v7x" and N == 1),
    )
    n_hw = pl.cdiv(HW, t_hw)      # partial last block is masked by Pallas

    out_flat, att_flat = pl.pallas_call(
        _spatial_attention_kernel,
        out_shape=(
            jax.ShapeDtypeStruct((N, C, HW), dtype),
            jax.ShapeDtypeStruct((N, 1, HW), dtype),
        ),
        grid_spec=pltpu.PrefetchScalarGridSpec(
            num_scalar_prefetch=0,
            grid=(N, n_hw),
            in_specs=[
                pl.BlockSpec((1, C, t_hw), lambda n, j: (n, 0, j)),
                pl.BlockSpec((1, C), lambda n, j: (0, 0)),
                pl.BlockSpec(memory_space=pltpu.MemorySpace.SMEM),
            ],
            out_specs=[
                pl.BlockSpec((1, C, t_hw), lambda n, j: (n, 0, j)),
                pl.BlockSpec((1, 1, t_hw), lambda n, j: (n, 0, j)),
            ],
        ),
        compiler_params=pltpu.CompilerParams(
            dimension_semantics=("parallel", "parallel"),
            vmem_limit_bytes=vmem_budget,
        ),
    )(x, w, b)

    out = out_flat.reshape(N, C, H, W)
    att = att_flat.reshape(N, 1, H, W)
    return out, att


if __name__ == "__main__":
    key = jax.random.PRNGKey(0)
    k_feat, k_w, k_b, k_feat2 = jax.random.split(key, 4)

    def _reference(features, weight, bias):
        c = features.shape[1]
        att = jnp.einsum("nchw,c->nhw", features, weight.reshape(c)) + bias[0]
        att = att[:, None, :, :]
        return features * att, att

    # Deterministic synthetic parameters for Conv2d(C, 1, kernel_size=(1, 1)).
    N, C, H, W = 2, 8, 16, 16
    features = jax.random.normal(k_feat, (N, C, H, W), dtype=jnp.float32)
    weight = jax.random.normal(k_w, (1, C, 1, 1), dtype=jnp.float32) * 0.1
    bias = jax.random.normal(k_b, (1,), dtype=jnp.float32) * 0.1

    # Case 1: H*W a multiple of 128.
    out, att = spatial_attention_pallas(features, weight, bias)
    out = jax.block_until_ready(out)
    att = jax.block_until_ready(att)
    out_ref, att_ref = _reference(features, weight, bias)
    assert jnp.allclose(att, att_ref, atol=1e-5, rtol=1e-5)
    assert jnp.allclose(out, out_ref, atol=1e-5, rtol=1e-5)

    # Case 2: ragged H*W (400, not a multiple of 128) exercises the cdiv/masked path.
    N2, H2, W2 = 1, 20, 20
    features2 = jax.random.normal(k_feat2, (N2, C, H2, W2), dtype=jnp.float32)
    out2, att2 = spatial_attention_pallas(features2, weight, bias)
    out2 = jax.block_until_ready(out2)
    att2 = jax.block_until_ready(att2)
    out2_ref, att2_ref = _reference(features2, weight, bias)
    assert jnp.allclose(att2, att2_ref, atol=1e-5, rtol=1e-5)
    assert jnp.allclose(out2, out2_ref, atol=1e-5, rtol=1e-5)

    print("KERNEL_OK")
</pallas_src>

<mosaic_0001>
module attributes {stable_mosaic.version = 11 : i64} {
  func.func @_spatial_attention_kernel(%arg0: i32, %arg1: i32, %arg2: memref<1x8x256xf32, #tpu.memory_space<vmem>>, %arg3: memref<1x8xf32, #tpu.memory_space<vmem>>, %arg4: memref<1xf32, #tpu.memory_space<smem>>, %arg5: memref<1x8x256xf32, #tpu.memory_space<vmem>>, %arg6: memref<1x1x256xf32, #tpu.memory_space<vmem>>) attributes {dimension_semantics = [#tpu.dimension_semantics<parallel>, #tpu.dimension_semantics<parallel>], iteration_bounds = array<i64: 2, 1>, scalar_prefetch = 0 : i64, scratch_operands = 0 : i64, tpu.core_type = #tpu.core_type<tc>, window_params = [{transform_indices = @transform_0, window_bounds = array<i64: 1, 8, 256>}, {pipeline_mode = #tpu.pipeline_mode<synchronous>, transform_indices = @transform_1, window_bounds = array<i64: 1, 8>}, {transform_indices = @transform_2, window_bounds = array<i64: 1>}, {transform_indices = @transform_3, window_bounds = array<i64: 1, 8, 256>}, {transform_indices = @transform_4, window_bounds = array<i64: 1, 1, 256>}]} {
    %c0 = arith.constant 0 : index
    %c0_0 = arith.constant 0 : index
    %c0_1 = arith.constant 0 : index
    %0 = vector.load %arg2[%c0, %c0_0, %c0_1] : memref<1x8x256xf32, #tpu.memory_space<vmem>>, vector<1x8x256xf32>
    %1 = vector.shape_cast %0 : vector<1x8x256xf32> to vector<8x256xf32>
    %c0_2 = arith.constant 0 : index
    %c0_3 = arith.constant 0 : index
    %2 = vector.load %arg3[%c0_2, %c0_3] : memref<1x8xf32, #tpu.memory_space<vmem>>, vector<1x8xf32>
    %c0_4 = arith.constant 0 : index
    %3 = memref.load %arg4[%c0_4] : memref<1xf32, #tpu.memory_space<smem>>
    %cst = arith.constant dense<0.000000e+00> : vector<1x256xf32>
    %4 = tpu.matmul %2, %1, %cst {dimension_numbers = #tpu.dot_dimension_numbers<[1], [0], [0], [1], [0, 0, 1, 1], [], []>} : vector<1x8xf32>, vector<8x256xf32>, vector<1x256xf32> -> vector<1x256xf32>
    %5 = vector.broadcast %3 : f32 to vector<1x256xf32>
    %6 = arith.addf %4, %5 : vector<1x256xf32>
    %c0_5 = arith.constant 0 : index
    %c0_6 = arith.constant 0 : index
    %c0_7 = arith.constant 0 : index
    %7 = vector.load %arg6[%c0_5, %c0_6, %c0_7] : memref<1x1x256xf32, #tpu.memory_space<vmem>>, vector<1x1x256xf32>
    %8 = vector.shape_cast %7 : vector<1x1x256xf32> to vector<1x256xf32>
    %9 = vector.shape_cast %6 : vector<1x256xf32> to vector<1x1x256xf32>
    tpu.vector_store %arg6[%c0_5, %c0_6, %c0_7], %9 {strides = array<i32>} : memref<1x1x256xf32, #tpu.memory_space<vmem>>, vector<1x1x256xf32>,
    %10 = vector.broadcast %6 : vector<1x256xf32> to vector<8x256xf32>
    %11 = arith.mulf %1, %10 : vector<8x256xf32>
    %c0_8 = arith.constant 0 : index
    %c0_9 = arith.constant 0 : index
    %c0_10 = arith.constant 0 : index
    %12 = vector.load %arg5[%c0_8, %c0_9, %c0_10] : memref<1x8x256xf32, #tpu.memory_space<vmem>>, vector<1x8x256xf32>
    %13 = vector.shape_cast %12 : vector<1x8x256xf32> to vector<8x256xf32>
    %14 = vector.shape_cast %11 : vector<8x256xf32> to vector<1x8x256xf32>
    tpu.vector_store %arg5[%c0_8, %c0_9, %c0_10], %14 {strides = array<i32>} : memref<1x8x256xf32, #tpu.memory_space<vmem>>, vector<1x8x256xf32>,
    return
  }
  func.func @transform_0(%arg0: i32, %arg1: i32) -> (i32, i32, i32) {
    %c0_i32 = arith.constant 0 : i32
    %c0_i32_0 = arith.constant 0 : i32
    return %arg0, %c0_i32, %arg1 : i32, i32, i32
  }
  func.func @transform_1(%arg0: i32, %arg1: i32) -> (i32, i32) {
    %c0_i32 = arith.constant 0 : i32
    %c0_i32_0 = arith.constant 0 : i32
    %c0_i32_1 = arith.constant 0 : i32
    return %c0_i32, %c0_i32_0 : i32, i32
  }
  func.func @transform_2(%arg0: i32, %arg1: i32) -> i32 {
    %c0_i32 = arith.constant 0 : i32
    %c0_i32_0 = arith.constant 0 : i32
    return %c0_i32 : i32
  }
  func.func @transform_3(%arg0: i32, %arg1: i32) -> (i32, i32, i32) {
    %c0_i32 = arith.constant 0 : i32
    %c0_i32_0 = arith.constant 0 : i32
    return %arg0, %c0_i32, %arg1 : i32, i32, i32
  }
  func.func @transform_4(%arg0: i32, %arg1: i32) -> (i32, i32, i32) {
    %c0_i32 = arith.constant 0 : i32
    %c0_i32_0 = arith.constant 0 : i32
    return %arg0, %c0_i32, %arg1 : i32, i32, i32
  }
}

</mosaic_0001>

<bundles_post_ra>
// kernel: tpu_custom_call.1
= control target key start
LH: loop header
LB: loop body
LE: loop exit
PB: predicated region body
PF: predicated region fallthrough
CT: control target
= control target key end

     0   :  { %s1122_s0 = inlined_call_operand.hbm [shape: f32[2,8,256], index: 0, kind: input, shape index: {}]   ;;  %s1123_s1 = inlined_call_operand.hbm [shape: f32[1,8], index: 1, kind: input, shape index: {}]   ;;  %s1124_s2 = inlined_call_operand.<no memory space> [shape: f32[1], index: 2, kind: input, shape index: {}]   ;;  %s1125_s3 = inlined_call_operand.hbm [shape: f32[2,8,256], index: 3, kind: output, shape index: {0}]   ;;  %s1126_s4 = inlined_call_operand.hbm [shape: f32[2,1,256], index: 4, kind: output, shape index: {1}]  }
   0x1   :  { %10 = sst [smem:[#allocation2]] %s1124_s2 }
   0x2   :  { %11 = vsyncpa [#allocation4], 0 }
   0x3   :  { %13 = vsyncpa [#allocation4 + $0x1], 0 }
   0x4   :  { %14 = vsyncpa [#allocation7], 0 }
   0x5   :  { %15 = vsyncpa [#allocation5], 0 }
   0x6   :  { %17 = vsyncpa [#allocation5 + $0x1], 0 }
   0x7   :  { %18 = vsyncpa [#allocation10], 0 }
   0x8   :  { %20 = vsyncpa [#allocation10 + $0x1], 0  ;;  %s861_s17 = smov 0   ;;  %s863_s18 = smov 0  }
   0x9   :  { %s865_s19 = smov 0   ;;  %s867_s20 = smov 0  }
   0xa   :  { %s869_s21 = smov 0   ;;  %s871_s22 = smov 0  }
   0xb LB: > { %s544_s2 = sadd.s32 4294967295, %s825_s22   ;;  %s545_s23 = sadd.s32 4294967294, %s825_s22   ;;  %s825_s22 = sphi %s871_s22, %s26_s22   ;;  %s821_s21 = sphi %s869_s21, %s1153_s21   ;;  %s817_s20 = sphi %s867_s20, %s1152_s20   ;;  %s813_s19 = sphi %s865_s19, %s1151_s19   ;;  %s809_s18 = sphi %s863_s18, %s1150_s18   ;;  %s805_s17 = sphi %s861_s17, %s1149_s17  }
   0xc   : > { %p60_p0 = scmp.ne.s32.totalorder %s809_s18, %s805_s17  ;;  %p895_p1 = scmp.eq.s32.totalorder %s544_s2, 0 }
   0xd   : > { %p899_p2 = scmp.eq.s32.totalorder %s544_s2, 1  ;;  %p134_p3 = scmp.eq.s32.totalorder %s545_s23, 1 }
   0xe   : > { %s1131_s24 = scalar_select %p895_p1, 1, 0 }
   0xf   : > { %s1132_s25 = scalar_select %p899_p2, 1, 0 }
  0x10   : > { %p905_p4 = por %p895_p1, %p60_p0  ;;  %p546_p5 = scmp.ge.s32.totalorder %s825_s22, 1 }
  0x11   : > { %p910_p6 = por %p134_p3, %p60_p0  ;;  %p169_p7 = scmp.lt.s32.totalorder %s825_s22, 3 }
  0x12   : > { %s1133_s26 = scalar_select %p905_p4, 1, 0 }
  0x13   : > { %s1134_s27 = scalar_select %p910_p6, 1, 0 }
  0x14   : > { %p915_p8 = pnand %p546_p5, %p169_p7  ;;  %s827_s29 = smov [#allocation6]  }
  0x15   : > { %s182_s30 = sshll.u32 %s827_s29, 4  ;;  %s38_s6 = sadd.s32 1, %s821_s21  ;;  %s183_s30 = int_to_ptr.vmem [resolvable:$true] %s182_s30 }
  0x16   : > { %s1135_s28 = scalar_select %p915_p8, 1, 0 }
  0x17   : > { %p579_p10 = pneg %p915_p8  ;;  %s47_s7 = sadd.s32 1, %s813_s19 }
  0x18   : > { %p930_p12 = scmp.ge.s32.totalorder %s38_s6, 2  ;;  %s649_s11 = scalar_lea.hbm %s1123_s1, 16 }
  0x19   : > { %p924_p11 = pnand %p579_p10, %p895_p1  ;;  %p650_p13 = scmp.ne.s32.totalorder %s1123_s1, %s649_s11 }
  0x1a   : > { %s1137_s8 = scalar_select %p930_p12, 1, 0 }
  0x1b   : > { %p651_p0 = pneg %p924_p11  ;;  %p656_p7 = scmp.lt.u32.totalorder %s649_s11, %s1123_s1 }
  0x1d   : > { %p652_p3 = pnand %p651_p0, %p650_p13 }
  0x1f   : > { %p653_p5 = pneg %p652_p3 }
  0x21   : > { %p658_p10 = pnand %p656_p7, %p653_p5 }
  0x23   : > { %661 = shalt.err (!%p658_p10)
}
  0x24   : > { %s662_s16 = scalar_lea.vmem %s183_s30, 16  ;;  %s669_s2 = scalar_lea.vmem %s183_s30, 32 }
  0x25   : > { %p663_p9 = scmp.ne.s32.totalorder %s183_s30, %s662_s16  ;;  %p670_p4 = scmp.lt.s32.totalorder %s183_s30, %s183_s30 }
  0x26   : > { %p671_p8 = scmp.lt.s32.totalorder %s669_s2, %s662_s16 }
  0x27   : > { %p665_p6 = pnand %p663_p9, %p651_p0 }
  0x28   : > { %p672_p2 = por %p671_p8, %p670_p4 }
  0x29   : > { %p666_p1 = pneg %p665_p6 }
  0x2b   : > { %p673_p12 = pnand %p672_p2, %p666_p1 }
  0x2d   : > { %676 = shalt.err (!%p673_p12)
}
  0x2e   : > { %582 = dma.hbm_to_vmem [thread:$0]  (!%p924_p11), %s1123_s1, 16, %s183_s30, [#allocation7]  }
  0x2f   : > { %p1138_p4 = scmp.ne.s32.totalorder %s1137_s8, 0  ;;  %p54_p1 = scmp.ne.s32.totalorder %s813_s19, %s809_s18 }
  0x30   : > { %p55_p2 = scmp.eq.s32.totalorder %s825_s22, 0  ;;  %p595_p6 = scmp.lt.s32.totalorder %s825_s22, 2 }
  0x31   : > { %s1155_s6 = smov (%p1138_p4, %s38_s6), 0  ;;  %p1139_p12 = scmp.ne.s32.totalorder %s1132_s25, 0 }
  0x32   : > { %s42_s5 = ssub.s32 %s821_s21, %s1155_s6  ;;  %p56_p9 = por %p55_p2, %p54_p1 }
  0x33   : > { %p45_p8 = scmp.eq.s32.totalorder %s42_s5, 0  ;;  %p962_p13 = por %p1139_p12, %p54_p1 }
  0x34   : > { %s196_s10 = sand.u32 1, %s813_s19   ;;  %s566_s8 = sshll.u32 %s821_s21, 8 }
  0x35   : > { %s970_s11 = scalar_select %p45_p8, %s813_s19, %s47_s7  }
  0x36   : > { %s549_s30 = sshll.u32 %s196_s10, 4  ;;  %s976_s14 = scalar_lea.hbm %s1122_s0, %s566_s8 }
  0x37   : > { %s200_s25 = scalar_lea.vmem [#allocation3], %s549_s30  ;;  %p980_p11 = pnand %p595_p6, %p56_p9 }
  0x38   : > { %s210_s15 = sshll.u32 %s200_s25, 4  ;;  %s197_s7 = scalar_lea.sflag [#allocation4], %s196_s10  ;;  %s978_s15 = int_to_ptr.vmem [resolvable:$true] %s210_s15 }
  0x39   : > { %s677_s2 = scalar_lea.hbm %s976_s14, 256  ;;  %p679_p3 = pneg %p980_p11 }
  0x3a   : > { %p678_p0 = scmp.ne.s32.totalorder %s976_s14, %s677_s2  ;;  %s682_s5 = scalar_lea.hbm %s1122_s0, 512 }
  0x3b   : > { %p683_p10 = scmp.lt.u32.totalorder %s976_s14, %s1122_s0  ;;  %p684_p4 = scmp.lt.u32.totalorder %s682_s5, %s677_s2 }
  0x3c   : > { %p680_p5 = pnand %p679_p3, %p678_p0  ;;  %p686_p2 = scmp.lt.u32.totalorder %s677_s2, %s976_s14 }
  0x3d   : > { %p685_p1 = por %p684_p4, %p683_p10 }
  0x3e   : > { %p681_p7 = pneg %p680_p5 }
  0x3f   : > { %p687_p6 = por %p686_p2, %p685_p1 }
  0x41   : > { %p688_p8 = pnand %p687_p6, %p681_p7 }
  0x43   : > { %691 = shalt.err (!%p688_p8)
}
  0x44   : > { %s692_s10 = scalar_lea.vmem %s978_s15, 256  ;;  %s828_s12 = smov [#allocation3]  }
  0x45   : > { %p693_p9 = scmp.ne.s32.totalorder %s978_s15, %s692_s10  ;;  %s697_s13 = sshll.u32 %s828_s12, 4  ;;  %s698_s13 = int_to_ptr.vmem [resolvable:$false] %s697_s13 }
  0x46   : > { %s699_s25 = scalar_lea.vmem %s698_s13, 512  ;;  %p700_p5 = scmp.lt.s32.totalorder %s978_s15, %s698_s13 }
  0x47   : > { %p695_p12 = pnand %p693_p9, %p679_p3  ;;  %p701_p10 = scmp.lt.s32.totalorder %s699_s25, %s692_s10 }
  0x49   : > { %p696_p0 = pneg %p695_p12  ;;  %p702_p4 = por %p701_p10, %p700_p5 }
  0x4b   : > { %p703_p1 = pnand %p702_p4, %p696_p0 }
  0x4d   : > { %706 = shalt.err (!%p703_p1)
}
  0x4e   : > { %586 = dma.hbm_to_vmem [thread:$0]  (!%p980_p11), %s976_s14, 256, %s978_s15, %s197_s7  }
  0x4f   : > { %p1142_p7 = scmp.ne.s32.totalorder %s1135_s28, 0 }
  0x50   : > { %s1012_s2 = sand.u32 (!%p1142_p7), 1, %s809_s18   ;;  %p1143_p3 = scmp.ne.s32.totalorder (!%p1142_p7), %s1133_s26, 0 }
  0x51   : > { %219 = sbr.rel (%p1142_p7) target bundleno = 351 (0x15f), region = 32  ;;  %s553_s23 = sshll.u32 (!%p1142_p7), %s1012_s2, 4 }
  0x52   : > { %s222_s29 = scalar_lea.sflag (!%p1142_p7), [#allocation4], %s1012_s2  ;;  %s225_s5 = scalar_lea.vmem (!%p1142_p7), [#allocation3], %s553_s23 }
  0x58   : > { %788 = dma.done.wait (%p1143_p3), %s222_s29, 256  }
  0x59   : > { %790 = vsyncadd (%p1143_p3), %s222_s29, 4294967040  ;;  %p1144_p11 = scmp.ne.s32.totalorder %s1131_s24, 0 }
  0x5b   : > { %792 = dma.done.wait (%p1144_p11), [#allocation7], 16  }
  0x5c   : > { %794 = vsyncadd (%p1144_p11), [#allocation7], 4294967280  ;;  %v829_v0 = vmov 0.0   ;;  %v263_v1 = vld [vmem:[%s225_s5 + $0x8] sm:$0xff]  ;;  %v262_v2 = vld [vmem:[%s225_s5] sm:$0xff]  ;;  %vm267_vm0 = vcmask 64512   ;;  %v348_v4 = vlaneseq }
  0x5d   : > { %335 = vmatprep.mubr.f32.mxu0 %v829_v0  ;;  %v264_v3 = vld [vmem:[#allocation6] sm:$0x1]  ;;  %271 = vmatprep.subr.mxu0 %v263_v1  ;;  %s265_s28 = sld [smem:[#allocation2]]  ;;  %v830_v5 = vmov 1966171168   ;;  %s556_s24 = sshll.u32 %s1012_s2, 1 }
  0x5e   : > { %272 = vmatpush1.msra.mxu0 %v262_v2  ;;  %v346_v6 = vunpack.c.l.s4 %v830_v5  ;;  %v349_v7 = vshrl.u32 %v348_v4, 7  ;;  %s567_s26 = sshll.u32 %s817_s20, 8  ;;  %s251_s14 = scalar_lea.vmem [#allocation8], %s553_s23  ;;  %vm1041_vm1 = vcmp.lt.s32.totalorder %v348_v4, 256 }
  0x5f   : > { %557 = vmatmul.mubr.msk.f32.vlgmr.msra.gmra.mrb[0].mxu0 %vm267_vm0, %v264_v3  ;;  %s399_s15 = sshll.u32 %s251_s14, 4  ;;  %s568_s16 = sshll.u32 %s817_s20, 5  ;;  %s1039_s15 = int_to_ptr.vmem [resolvable:$true] %s399_s15 }
  0x60   : > { %v347_v9 = vunpack.c.0.s8 %v346_v6  ;;  %v367_v10 = vsub.s32 0, %v349_v7  ;;  %s1031_s7 = scalar_lea.vmem [#allocation9], %s556_s24  ;;  %s1037_s12 = scalar_lea.hbm %s1125_s3, %s567_s26 }
  0x61   : > { %s415_s30 = sshll.u32 %s1031_s7, 4  ;;  %s1048_s25 = scalar_lea.hbm %s1126_s4, %s568_s16  ;;  %s1050_s30 = int_to_ptr.vmem [resolvable:$true] %s415_s30 }
  0x62   : > { %v350_v15 = vsub.s32 %v347_v9, %v349_v7  ;;  %s378_s23 = scalar_lea.sflag [#allocation5], %s1012_s2  ;;  %s707_s29 = scalar_lea.vmem %s1039_s15, 256 }
  0x63   : > { %v266_v8 = vstv %s265_s28  ;;  %p708_p2 = scmp.ne.s32.totalorder %s1039_s15, %s707_s29  ;;  %s831_s5 = smov [#allocation8]  }
  0x64   : > { %s711_s28 = sshll.u32 %s831_s5, 4  ;;  %s712_s28 = int_to_ptr.vmem [resolvable:$false] %s711_s28 }
  0x65   : > { %p709_p6 = pnand %p708_p2, %p962_p13  ;;  %s713_s24 = scalar_lea.vmem %s712_s28, 512 }
  0x66   : > { %p714_p9 = scmp.lt.s32.totalorder %s1039_s15, %s712_s28  ;;  %p715_p12 = scmp.lt.s32.totalorder %s713_s24, %s707_s29 }
  0x67   : > { %p710_p8 = pneg %p709_p6 }
  0x68   : > { %p716_p0 = por %p715_p12, %p714_p9 }
  0x6a   : > { %p717_p5 = pnand %p716_p0, %p710_p8 }
 0x132   : > { %v337_v11 = vpop.f32.mrb[0].mxu0 }
 0x133   : > { %v338_v12 = vadd.f32 %v337_v11, %v266_v8  ;;  %v339_v13 = vpop.f32.mrb[1].mxu0 }
 0x134   : > { %v340_v14 = vadd.f32 %v339_v13, %v266_v8 }
 0x135   : > { %v368_v16 = vrot.slane %v338_v12, %v367_v10 }
 0x136   : > { %v344_v17 = vcombine.low %v338_v12, %v340_v14  ;;  %v372_v18 = vrot.slane %v340_v14, %v367_v10 }
 0x137   : > { %v373_v19 = vmul.f32 %v368_v16, %v262_v2 }
 0x138   : > { %v351_v20 = vrot.slane %v344_v17, %v350_v15  ;;  %v374_v21 = vmul.f32 %v372_v18, %v263_v1 }
 0x139   : > { %375 = vst [vmem:[%s251_s14] sm:$0xff] %v373_v19 }
 0x13a   : > { %v358_v23 = vrot.slane %v351_v20, %v350_v15  ;;  %376 = vst [vmem:[%s251_s14 + $0x8] sm:$0xff] %v374_v21 }
 0x13b   : > { %720 = shalt.err (!%p717_p5)
}
 0x13c   : > { %s721_s26 = scalar_lea.hbm %s1037_s12, 256  ;;  %s725_s8 = scalar_lea.hbm %s1125_s3, 512 }
 0x13d   : > { %p722_p10 = scmp.ne.s32.totalorder %s1037_s12, %s721_s26  ;;  %p726_p7 = scmp.lt.u32.totalorder %s1037_s12, %s1125_s3 }
 0x13e   : > { %p727_p3 = scmp.lt.u32.totalorder %s725_s8, %s721_s26  ;;  %p729_p2 = scmp.lt.u32.totalorder %s721_s26, %s1037_s12 }
 0x13f   : > { %p723_p4 = pnand %p722_p10, %p962_p13 }
 0x140   : > { %p728_p11 = por %p727_p3, %p726_p7 }
 0x141   : > { %p724_p1 = pneg %p723_p4 }
 0x142   : > { %p730_p6 = por %p729_p2, %p728_p11 }
 0x144   : > { %p731_p8 = pnand %p730_p6, %p724_p1 }
 0x146   : > { %734 = shalt.err (!%p731_p8)
}
 0x147   : > { %575 = dma.vmem_to_hbm [thread:$0]  (%p962_p13), %s1039_s15, 256, %s1037_s12, %s378_s23   ;;  %364 = vst.msk [vmem:[%s1031_s7] sm:$0x3] %vm1041_vm1, %v358_v23 }
 0x148   : > { %s383_s13 = scalar_lea.sflag [#allocation10], %s1012_s2  ;;  %s735_s29 = scalar_lea.vmem %s1050_s30, 32 }
 0x149   : > { %p736_p9 = scmp.ne.s32.totalorder %s1050_s30, %s735_s29  ;;  %s832_s5 = smov [#allocation9]  }
 0x14a   : > { %s739_s28 = sshll.u32 %s832_s5, 4  ;;  %s740_s28 = int_to_ptr.vmem [resolvable:$false] %s739_s28 }
 0x14b   : > { %p737_p12 = pnand %p736_p9, %p962_p13  ;;  %s741_s24 = scalar_lea.vmem %s740_s28, 64 }
 0x14c   : > { %p742_p5 = scmp.lt.s32.totalorder %s1050_s30, %s740_s28  ;;  %p743_p10 = scmp.lt.s32.totalorder %s741_s24, %s735_s29 }
 0x14d   : > { %p738_p0 = pneg %p737_p12 }
 0x14e   : > { %p744_p4 = por %p743_p10, %p742_p5 }
 0x150   : > { %p745_p1 = pnand %p744_p4, %p738_p0 }
 0x152   : > { %748 = shalt.err (!%p745_p1)
}
 0x153   : > { %s749_s2 = scalar_lea.hbm %s1048_s25, 32  ;;  %s753_s12 = scalar_lea.hbm %s1126_s4, 64 }
 0x154   : > { %p750_p7 = scmp.ne.s32.totalorder %s1048_s25, %s749_s2  ;;  %p754_p2 = scmp.lt.u32.totalorder %s1048_s25, %s1126_s4 }
 0x155   : > { %p755_p6 = scmp.lt.u32.totalorder %s753_s12, %s749_s2  ;;  %p757_p9 = scmp.lt.u32.totalorder %s749_s2, %s1048_s25 }
 0x156   : > { %p751_p3 = pnand %p750_p7, %p962_p13 }
 0x157   : > { %p756_p8 = por %p755_p6, %p754_p2 }
 0x158   : > { %p752_p11 = pneg %p751_p3 }
 0x159   : > { %p758_p12 = por %p757_p9, %p756_p8 }
 0x15b   : > { %p759_p0 = pnand %p758_p12, %p752_p11 }
 0x15d   : > { %762 = shalt.err (!%p759_p0)
}
 0x15e   : > { %576 = dma.vmem_to_hbm [thread:$0]  (%p962_p13), %s1050_s30, 32, %s1048_s25, %s383_s13  }
 0x15f PF: > { %s427_s14 = sand.u32 1, %s805_s17   ;;  %p1147_p5 = scmp.ne.s32.totalorder %s1134_s27, 0 }
 0x160   : > { %p1148_p10 = scmp.ge.s32.totalorder %s825_s22, 2  ;;  %s428_s16 = scalar_lea.sflag [#allocation5], %s427_s14 }
 0x162   : > { %p588_p4 = pnand %p1148_p10, %p1147_p5 }
 0x164   : > { %796 = dma.done.wait (!%p588_p4), %s428_s16, 256  }
 0x165   : > { %798 = vsyncadd (!%p588_p4), %s428_s16, 4294967040  ;;  %s437_s8 = scalar_lea.sflag [#allocation10], %s427_s14 }
 0x166   : > { %800 = dma.done.wait (!%p588_p4), %s437_s8, 32  }
 0x167   : > { %802 = vsyncadd (!%p588_p4), %s437_s8, 4294967264  ;;  %s26_s22 = sadd.s32 1, %s825_s22   ;;  %s1149_s17 = smov %s809_s18 }
 0x168   : > { %p23_p1 = scmp.ge.s32.totalorder %s26_s22, 4   ;;  %s1150_s18 = smov %s813_s19 }
 0x169   : > { %s1151_s19 = smov %s970_s11  ;;  %s1152_s20 = smov %s821_s21 }
 0x16a   : > { %s1153_s21 = smov %s1155_s6  ;;  %25 = sbr.rel (!%p23_p1) target bundleno = 11 (0xb), region = 98 }
 0x171   :  { %442 = vsyncpa [#allocation4], 1 }
 0x172   :  { %444 = vsyncpa [#allocation4 + $0x1], 1 }
 0x173   :  { %445 = vsyncpa [#allocation7], 1 }
 0x174   :  { %446 = vsyncpa [#allocation5], 1 }
 0x175   :  { %448 = vsyncpa [#allocation5 + $0x1], 1 }
 0x176   :  { %449 = vsyncpa [#allocation10], 1 }
 0x177   :  { %451 = vsyncpa [#allocation10 + $0x1], 1 }

</bundles_post_ra>
